<compile_context>
chip_gen: v5e
topology: v5e:2x2
jax: 0.10.0
libtpu: 0.0.40
codegen_flags: <defaults>
</compile_context>

<pallas_src>
import functools

import jax
import jax.numpy as jnp
from jax.experimental import pallas as pl
from jax.experimental.pallas import tpu as pltpu


# -----------------------------------------------------------------------------
# Fused kernel:
#   text = tanh(mean @ pool_w + pool_b)
#   conf = onehot(conf_ids) @ conf_table ; src = onehot(src_ids) @ src_table
#   rep  = concat([text, conf, src])            (built in VMEM scratch)
#   h    = relu(rep @ w1 + b1)
#   logits = sum(h * w2_row, axis=-1)           (VPU mul + lane reduce)
#   out  = softmax(logits, axis=0)              (batch axis, single block)
# -----------------------------------------------------------------------------
def _filter_fused_kernel(mean_ref, pool_w_ref, pool_b_ref,
                         conf_ids_ref, conf_tab_ref,
                         src_ids_ref, src_tab_ref,
                         w1_ref, b1_ref, w2_ref,
                         out_ref, rep_scratch):
    B, dim = mean_ref.shape
    n_conf, side = conf_tab_ref.shape
    n_src = src_tab_ref.shape[0]

    # Surrogate pooler: tanh(mean @ pool_w + pool_b)  -> (B, dim)
    text = jnp.tanh(
        jnp.dot(mean_ref[...], pool_w_ref[...], preferred_element_type=jnp.float32)
        + pool_b_ref[...])

    # Embedding gathers fused as exact one-hot matmuls (one-hot entries are
    # exactly 0/1, so the gather result is bit-identical to a table lookup).
    conf_oh = (jax.lax.broadcasted_iota(jnp.int32, (B, n_conf), 1)
               == conf_ids_ref[...]).astype(jnp.float32)            # (B, 10)
    src_oh = (jax.lax.broadcasted_iota(jnp.int32, (B, n_src), 1)
              == src_ids_ref[...]).astype(jnp.float32)              # (B, 3)
    conf_rep = jnp.dot(conf_oh, conf_tab_ref[...],
                       preferred_element_type=jnp.float32)          # (B, side)
    src_rep = jnp.dot(src_oh, src_tab_ref[...],
                      preferred_element_type=jnp.float32)           # (B, side)

    # concat([text, conf, src]) via static lane-offset stores into scratch so
    # the projection's first layer is ONE MXU dot.
    rep_scratch[:, :dim] = text
    rep_scratch[:, dim:dim + side] = conf_rep
    rep_scratch[:, dim + side:] = src_rep

    h = jnp.maximum(
        jnp.dot(rep_scratch[...], w1_ref[...], preferred_element_type=jnp.float32)
        + b1_ref[...],
        0.0)                                                        # (B, dim)

    # Second linear (dim -> 1) as VPU multiply + lane reduce (w2 passed as a
    # (1, dim) row).  b2 is omitted: softmax(axis=0) is shift-invariant.
    logits = jnp.sum(h * w2_ref[...], axis=-1, keepdims=True)       # (B, 1)

    # Numerically stable softmax over the batch axis (whole batch in-block).
    m = jnp.max(logits, axis=0, keepdims=True)
    e = jnp.exp(logits - m)
    denom = jnp.sum(e, axis=0, keepdims=True)
    inv = pl.reciprocal(denom, approx=True)      # EUP slot (otherwise idle)
    inv = inv * (2.0 - denom * inv)              # one Newton step -> f32 accuracy
    out_ref[...] = e * inv


def filter_head_fused(mean, confidence, source, params, *, dim, side_dim):
    """Fused pooler + embeddings + projection MLP + softmax on TPU via Pallas.

    mean: (B, dim) f32 masked-mean pooled token representation.
    confidence/source: (B,) int indices.
    returns probs: (B,) f32 softmax over the batch axis.
    """
    B = mean.shape[0]
    conf_ids = confidence.reshape(-1, 1).astype(jnp.int32)
    src_ids = source.reshape(-1, 1).astype(jnp.int32)
    pool_b = params["pool_b"].reshape(1, dim)
    b1 = params["b1"].reshape(1, dim)
    w2_row = params["w2"].reshape(1, dim)   # (dim, 1) column -> (1, dim) row
    # params["b2"] is intentionally NOT passed: softmax over axis 0 cancels it.

    vmem = pl.BlockSpec(memory_space=pltpu.MemorySpace.VMEM)  # whole-array blocks
    probs_2d = pl.pallas_call(
        _filter_fused_kernel,
        out_shape=jax.ShapeDtypeStruct((B, 1), jnp.float32),
        in_specs=[vmem] * 10,
        out_specs=vmem,
        scratch_shapes=[pltpu.VMEM((B, dim + 2 * side_dim), jnp.float32)],
    )(mean, params["pool_w"], pool_b,
      conf_ids, params["conf_emb"],
      src_ids, params["src_emb"],
      params["w1"], b1, w2_row)
    return probs_2d[:, 0]   # squeeze -> (B,)


# -----------------------------------------------------------------------------
# FilterModel in JAX: deterministic parameters + forward()
# -----------------------------------------------------------------------------
def init_params(key, *, vocab=50, dim=32, side_dim=32):
    ks = jax.random.split(key, 8)
    scale = 0.02
    return {
        # surrogate "base" encoder params
        "tok_emb": scale * jax.random.normal(ks[0], (vocab, dim), jnp.float32),
        "type_emb": scale * jax.random.normal(ks[1], (2, dim), jnp.float32),
        "pool_w": scale * jax.random.normal(ks[2], (dim, dim), jnp.float32),
        "pool_b": jnp.zeros((dim,), jnp.float32),
        # nn.Embedding(10, side_dim), nn.Embedding(3, side_dim)
        "conf_emb": scale * jax.random.normal(ks[3], (10, side_dim), jnp.float32),
        "src_emb": scale * jax.random.normal(ks[4], (3, side_dim), jnp.float32),
        # projection: Linear(2*side_dim + dim, dim) -> ReLU -> Linear(dim, 1)
        "w1": scale * jax.random.normal(ks[5], (dim + 2 * side_dim, dim), jnp.float32),
        "b1": jnp.zeros((dim,), jnp.float32),
        "w2": scale * jax.random.normal(ks[6], (dim, 1), jnp.float32),
        "b2": jnp.zeros((1,), jnp.float32),
    }


def _masked_mean_tokens(params, input_tokens, input_types, input_masks):
    """Surrogate transformer body: token+type embedding + masked mean (XLA)."""
    emb = (jnp.take(params["tok_emb"], input_tokens, axis=0)
           + jnp.take(params["type_emb"], input_types, axis=0))     # (B, S, dim)
    mask = input_masks.astype(jnp.float32)[..., None]               # (B, S, 1)
    summed = jnp.sum(emb * mask, axis=1)
    count = jnp.maximum(jnp.sum(mask, axis=1), 1.0)
    return summed / count                                           # (B, dim)


@functools.partial(jax.jit, static_argnames=("dim", "side_dim"))
def filter_model_forward(params, input_tokens, input_types, input_masks,
                         confidence, source, *, dim=32, side_dim=32):
    mean = _masked_mean_tokens(params, input_tokens, input_types, input_masks)
    return filter_head_fused(mean, confidence, source, params,
                             dim=dim, side_dim=side_dim)


def reference_forward(params, input_tokens, input_types, input_masks,
                      confidence, source, *, dim=32, side_dim=32):
    """Pure-JAX reference mirroring the PyTorch forward exactly (incl. b2)."""
    mean = _masked_mean_tokens(params, input_tokens, input_types, input_masks)
    text_rep = jnp.tanh(mean @ params["pool_w"] + params["pool_b"])
    conf_rep = jnp.take(params["conf_emb"], confidence, axis=0).reshape(-1, side_dim)
    src_rep = jnp.take(params["src_emb"], source, axis=0).reshape(-1, side_dim)
    rep = jnp.concatenate([text_rep, conf_rep, src_rep], axis=-1)
    h = jnp.maximum(rep @ params["w1"] + params["b1"], 0.0)
    logits = (h @ params["w2"] + params["b2"]).squeeze()
    return jax.nn.softmax(logits, axis=0)


if __name__ == "__main__":
    B, S, VOCAB, DIM, SIDE = 8, 8, 50, 32, 32

    key = jax.random.PRNGKey(0)
    k_par, k_tok, k_typ, k_conf, k_src = jax.random.split(key, 5)

    params = init_params(k_par, vocab=VOCAB, dim=DIM, side_dim=SIDE)

    input_tokens = jax.random.randint(k_tok, (B, S), 0, VOCAB, dtype=jnp.int32)
    input_types = jax.random.randint(k_typ, (B, S), 0, 2, dtype=jnp.int32)
    input_masks = jnp.ones((B, S), dtype=jnp.int32)
    confidence = jax.random.randint(k_conf, (B,), 0, 10, dtype=jnp.int32)
    source = jax.random.randint(k_src, (B,), 0, 3, dtype=jnp.int32)

    probs = filter_model_forward(params, input_tokens, input_types, input_masks,
                                 confidence, source, dim=DIM, side_dim=SIDE)
    probs = jax.block_until_ready(probs)

    ref = reference_forward(params, input_tokens, input_types, input_masks,
                            confidence, source, dim=DIM, side_dim=SIDE)

    assert probs.shape == (B,)
    assert jnp.allclose(jnp.sum(probs), 1.0, atol=1e-5)
    assert jnp.allclose(probs, ref, atol=1e-5, rtol=1e-5)
    print("KERNEL_OK")
</pallas_src>

<mosaic_0001>
module attributes {stable_mosaic.version = 11 : i64} {
  func.func @_filter_fused_kernel(%arg0: memref<8x32xf32, #tpu.memory_space<vmem>>, %arg1: memref<32x32xf32, #tpu.memory_space<vmem>>, %arg2: memref<1x32xf32, #tpu.memory_space<vmem>>, %arg3: memref<8x1xi32, #tpu.memory_space<vmem>>, %arg4: memref<10x32xf32, #tpu.memory_space<vmem>>, %arg5: memref<8x1xi32, #tpu.memory_space<vmem>>, %arg6: memref<3x32xf32, #tpu.memory_space<vmem>>, %arg7: memref<96x32xf32, #tpu.memory_space<vmem>>, %arg8: memref<1x32xf32, #tpu.memory_space<vmem>>, %arg9: memref<1x32xf32, #tpu.memory_space<vmem>>, %arg10: memref<8x1xf32, #tpu.memory_space<vmem>>, %arg11: memref<8x96xf32, #tpu.memory_space<vmem>>) attributes {dimension_semantics = [], scalar_prefetch = 0 : i64, scratch_operands = 1 : i64, tpu.core_type = #tpu.core_type<tc>} {
    %c0 = arith.constant 0 : index
    %c0_0 = arith.constant 0 : index
    %0 = vector.load %arg0[%c0, %c0_0] : memref<8x32xf32, #tpu.memory_space<vmem>>, vector<8x32xf32>
    %c0_1 = arith.constant 0 : index
    %c0_2 = arith.constant 0 : index
    %1 = vector.load %arg1[%c0_1, %c0_2] : memref<32x32xf32, #tpu.memory_space<vmem>>, vector<32x32xf32>
    %cst = arith.constant dense<0.000000e+00> : vector<8x32xf32>
    %2 = tpu.matmul %0, %1, %cst {dimension_numbers = #tpu.dot_dimension_numbers<[1], [0], [0], [1], [0, 0, 1, 1], [], []>} : vector<8x32xf32>, vector<32x32xf32>, vector<8x32xf32> -> vector<8x32xf32>
    %c0_3 = arith.constant 0 : index
    %c0_4 = arith.constant 0 : index
    %3 = vector.load %arg2[%c0_3, %c0_4] : memref<1x32xf32, #tpu.memory_space<vmem>>, vector<1x32xf32>
    %4 = vector.broadcast %3 : vector<1x32xf32> to vector<8x32xf32>
    %5 = arith.addf %2, %4 : vector<8x32xf32>
    %6 = math.tanh %5 : vector<8x32xf32>
    %7 = tpu.iota {dimensions = array<i32: 1>} : vector<8x10xi32>
    %c0_5 = arith.constant 0 : index
    %c0_6 = arith.constant 0 : index
    %8 = vector.load %arg3[%c0_5, %c0_6] : memref<8x1xi32, #tpu.memory_space<vmem>>, vector<8x1xi32>
    %9 = vector.broadcast %8 : vector<8x1xi32> to vector<8x10xi32>
    %10 = arith.cmpi eq, %7, %9 : vector<8x10xi32>
    %11 = arith.extui %10 : vector<8x10xi1> to vector<8x10xi32>
    %12 = arith.sitofp %11 : vector<8x10xi32> to vector<8x10xf32>
    %13 = tpu.iota {dimensions = array<i32: 1>} : vector<8x3xi32>
    %c0_7 = arith.constant 0 : index
    %c0_8 = arith.constant 0 : index
    %14 = vector.load %arg5[%c0_7, %c0_8] : memref<8x1xi32, #tpu.memory_space<vmem>>, vector<8x1xi32>
    %15 = vector.broadcast %14 : vector<8x1xi32> to vector<8x3xi32>
    %16 = arith.cmpi eq, %13, %15 : vector<8x3xi32>
    %17 = arith.extui %16 : vector<8x3xi1> to vector<8x3xi32>
    %18 = arith.sitofp %17 : vector<8x3xi32> to vector<8x3xf32>
    %c0_9 = arith.constant 0 : index
    %c0_10 = arith.constant 0 : index
    %19 = vector.load %arg4[%c0_9, %c0_10] : memref<10x32xf32, #tpu.memory_space<vmem>>, vector<10x32xf32>
    %cst_11 = arith.constant dense<0.000000e+00> : vector<8x32xf32>
    %20 = tpu.matmul %12, %19, %cst_11 {dimension_numbers = #tpu.dot_dimension_numbers<[1], [0], [0], [1], [0, 0, 1, 1], [], []>} : vector<8x10xf32>, vector<10x32xf32>, vector<8x32xf32> -> vector<8x32xf32>
    %c0_12 = arith.constant 0 : index
    %c0_13 = arith.constant 0 : index
    %21 = vector.load %arg6[%c0_12, %c0_13] : memref<3x32xf32, #tpu.memory_space<vmem>>, vector<3x32xf32>
    %cst_14 = arith.constant dense<0.000000e+00> : vector<8x32xf32>
    %22 = tpu.matmul %18, %21, %cst_14 {dimension_numbers = #tpu.dot_dimension_numbers<[1], [0], [0], [1], [0, 0, 1, 1], [], []>} : vector<8x3xf32>, vector<3x32xf32>, vector<8x32xf32> -> vector<8x32xf32>
    %c0_15 = arith.constant 0 : index
    %c0_16 = arith.constant 0 : index
    %23 = vector.load %arg11[%c0_15, %c0_16] : memref<8x96xf32, #tpu.memory_space<vmem>>, vector<8x32xf32>
    tpu.vector_store %arg11[%c0_15, %c0_16], %6 {strides = array<i32>} : memref<8x96xf32, #tpu.memory_space<vmem>>, vector<8x32xf32>,
    %c0_17 = arith.constant 0 : index
    %c32 = arith.constant 32 : index
    %24 = vector.load %arg11[%c0_17, %c32] : memref<8x96xf32, #tpu.memory_space<vmem>>, vector<8x32xf32>
    tpu.vector_store %arg11[%c0_17, %c32], %20 {strides = array<i32>} : memref<8x96xf32, #tpu.memory_space<vmem>>, vector<8x32xf32>,
    %c0_18 = arith.constant 0 : index
    %c64 = arith.constant 64 : index
    %25 = vector.load %arg11[%c0_18, %c64] : memref<8x96xf32, #tpu.memory_space<vmem>>, vector<8x32xf32>
    tpu.vector_store %arg11[%c0_18, %c64], %22 {strides = array<i32>} : memref<8x96xf32, #tpu.memory_space<vmem>>, vector<8x32xf32>,
    %c0_19 = arith.constant 0 : index
    %c0_20 = arith.constant 0 : index
    %26 = vector.load %arg11[%c0_19, %c0_20] : memref<8x96xf32, #tpu.memory_space<vmem>>, vector<8x96xf32>
    %c0_21 = arith.constant 0 : index
    %c0_22 = arith.constant 0 : index
    %27 = vector.load %arg7[%c0_21, %c0_22] : memref<96x32xf32, #tpu.memory_space<vmem>>, vector<96x32xf32>
    %cst_23 = arith.constant dense<0.000000e+00> : vector<8x32xf32>
    %28 = tpu.matmul %26, %27, %cst_23 {dimension_numbers = #tpu.dot_dimension_numbers<[1], [0], [0], [1], [0, 0, 1, 1], [], []>} : vector<8x96xf32>, vector<96x32xf32>, vector<8x32xf32> -> vector<8x32xf32>
    %c0_24 = arith.constant 0 : index
    %c0_25 = arith.constant 0 : index
    %29 = vector.load %arg8[%c0_24, %c0_25] : memref<1x32xf32, #tpu.memory_space<vmem>>, vector<1x32xf32>
    %30 = vector.broadcast %29 : vector<1x32xf32> to vector<8x32xf32>
    %31 = arith.addf %28, %30 : vector<8x32xf32>
    %cst_26 = arith.constant 0.000000e+00 : f32
    %32 = vector.broadcast %cst_26 : f32 to vector<8x32xf32>
    %33 = arith.maximumf %31, %32 : vector<8x32xf32>
    %c0_27 = arith.constant 0 : index
    %c0_28 = arith.constant 0 : index
    %34 = vector.load %arg9[%c0_27, %c0_28] : memref<1x32xf32, #tpu.memory_space<vmem>>, vector<1x32xf32>
    %35 = vector.broadcast %34 : vector<1x32xf32> to vector<8x32xf32>
    %36 = arith.mulf %33, %35 : vector<8x32xf32>
    %cst_29 = arith.constant dense<0.000000e+00> : vector<8xf32>
    %37 = vector.multi_reduction <add>, %36, %cst_29 [1] : vector<8x32xf32> to vector<8xf32>
    %38 = vector.shape_cast %37 : vector<8xf32> to vector<8x1xf32>
    %cst_30 = arith.constant dense<0xFF800000> : vector<1xf32>
    %39 = vector.multi_reduction <maximumf>, %38, %cst_30 [0] : vector<8x1xf32> to vector<1xf32>
    %40 = vector.shape_cast %39 : vector<1xf32> to vector<1x1xf32>
    %41 = vector.broadcast %40 : vector<1x1xf32> to vector<8x1xf32>
    %42 = arith.subf %38, %41 : vector<8x1xf32>
    %43 = math.exp %42 : vector<8x1xf32>
    %cst_31 = arith.constant dense<0.000000e+00> : vector<1xf32>
    %44 = vector.multi_reduction <add>, %43, %cst_31 [0] : vector<8x1xf32> to vector<1xf32>
    %45 = vector.shape_cast %44 : vector<1xf32> to vector<1x1xf32>
    %46 = tpu.reciprocal %45 {approx = true} : vector<1x1xf32> -> vector<1x1xf32>
    %47 = arith.mulf %45, %46 : vector<1x1xf32>
    %cst_32 = arith.constant 2.000000e+00 : f32
    %48 = vector.broadcast %cst_32 : f32 to vector<1x1xf32>
    %49 = arith.subf %48, %47 : vector<1x1xf32>
    %50 = arith.mulf %46, %49 : vector<1x1xf32>
    %51 = vector.broadcast %50 : vector<1x1xf32> to vector<8x1xf32>
    %52 = arith.mulf %43, %51 : vector<8x1xf32>
    %c0_33 = arith.constant 0 : index
    %c0_34 = arith.constant 0 : index
    %53 = vector.load %arg10[%c0_33, %c0_34] : memref<8x1xf32, #tpu.memory_space<vmem>>, vector<8x1xf32>
    tpu.vector_store %arg10[%c0_33, %c0_34], %52 {strides = array<i32>} : memref<8x1xf32, #tpu.memory_space<vmem>>, vector<8x1xf32>,
    return
  }
}

</mosaic_0001>

<bundles_post_ra>
// kernel: filter_model_forward.1
= control target key start
LH: loop header
LB: loop body
LE: loop exit
PB: predicated region body
PF: predicated region fallthrough
CT: control target
= control target key end

     0   :  { %v255_v0 = vmov 0   ;;  %vm120_vm0 = vcmask 1042432   ;;  %vm91_vm1 = vcmask 1041408   ;;  %vm44_vm2 = vcmask 261120   ;;  %s258_s17 = smov 64   ;;  %s395_s5 = inlined_call_operand.vmem [shape: s32[8,1], index: 5, kind: input, shape index: {}]   ;;  %s396_s3 = inlined_call_operand.vmem [shape: s32[8,1], index: 3, kind: input, shape index: {}]   ;;  %s397_s6 = inlined_call_operand.vmem [shape: f32[3,32], index: 6, kind: input, shape index: {}]   ;;  %s398_s4 = inlined_call_operand.vmem [shape: f32[10,32], index: 4, kind: input, shape index: {}]   ;;  %s399_s1 = inlined_call_operand.vmem [shape: f32[32,32], index: 1, kind: input, shape index: {}]   ;;  %s400_s0 = inlined_call_operand.vmem [shape: f32[8,32], index: 0, kind: input, shape index: {}]   ;;  %s401_s2 = inlined_call_operand.vmem [shape: f32[1,32], index: 2, kind: input, shape index: {}]   ;;  %s402_s7 = inlined_call_operand.vmem [shape: f32[96,32], index: 7, kind: input, shape index: {}]   ;;  %s403_s8 = inlined_call_operand.vmem [shape: f32[1,32], index: 8, kind: input, shape index: {}]   ;;  %s404_s9 = inlined_call_operand.vmem [shape: f32[1,32], index: 9, kind: input, shape index: {}]   ;;  %s405_s10 = inlined_call_operand.vmem [shape: f32[8,1], index: 10, kind: output, shape index: {}]  }
   0x1   :  { %245 = vset.pattern.permute.xlu0 %v255_v0  ;;  %v78_v1 = vld [vmem:[%s395_s5] sm:$0xff]  ;;  %v86_v4 = vld [vmem:[%s398_s4 + $0x8] sm:$0x3]  ;;  %v39_v6 = vld [vmem:[%s399_s1 + $0x18] sm:$0xff]  ;;  %v69_v11 = vlaneseq  ;;  %vm116_vm3 = vcmask 23552   ;;  %v256_v14 = vmov 0.0  }
   0x2   :  { %80 = vperm.xlu0 %245, %v78_v1   ;;  %v71_v2 = vld [vmem:[%s396_s3] sm:$0xff]  ;;  %236 = vmatpush.msk.msra.mxu1 %vm91_vm1, %v86_v4  ;;  %v38_v7 = vld [vmem:[%s399_s1 + $0x10] sm:$0xff]  ;;  %v37_v8 = vld [vmem:[%s399_s1 + $0x8] sm:$0xff]  ;;  %vm87_vm5 = vcmask 80896   ;;  %vm149_vm7 = vcmask 523520   ;;  %vm155_vm8 = vcmask 785920  }
   0x3   :  { %v115_v3 = vld [vmem:[%s397_s6] sm:$0x7]  ;;  %60 = vmatpush.msra.mxu0 %v39_v6  ;;  %v70_v12 = vand.u32 127, %v69_v11  ;;  %v169_v20 = vld [vmem:[%s402_s7 + $0x58] sm:$0xff]  ;;  %v168_v21 = vld [vmem:[%s402_s7 + $0x50] sm:$0xff]  ;;  %vm174_vm9 = vcmask 785408  }
   0x4   :  { %238 = vmatpush.msk.msra.mxu2 %vm120_vm0, %v115_v3  ;;  %v85_v5 = vld [vmem:[%s398_s4] sm:$0xff]  ;;  %182 = vmatpush.msra.mxu3 %v169_v20  ;;  %v167_v23 = vld [vmem:[%s402_s7 + $0x48] sm:$0xff]  ;;  %v165_v28 = vld [vmem:[%s402_s7 + $0x38] sm:$0xff]  ;;  %vm227_vm10 = vcmask 7168  }
   0x5   :  { %110 = vmatpush.msra.mxu1 %v85_v5  ;;  %61 = vmatpush.msra.mxu0 %v38_v7  ;;  %v36_v9 = vld [vmem:[%s399_s1] sm:$0xff]  ;;  %v164_v29 = vld [vmem:[%s402_s7 + $0x30] sm:$0xff]  ;;  %v163_v30 = vld [vmem:[%s402_s7 + $0x28] sm:$0xff] }
   0x6   :  { %v35_v10 = vld [vmem:[%s400_s0] sm:$0xff]  ;;  %183 = vmatpush.msra.mxu3 %v168_v21  ;;  %v161_v32 = vld [vmem:[%s402_s7 + $0x18] sm:$0xff]  ;;  %v160_v33 = vld [vmem:[%s402_s7 + $0x10] sm:$0xff] }
   0x7   :  { %62 = vmatpush.msra.mxu0 %v37_v8  ;;  %v246_v18 = vld [vmem:[%s401_s2] ss:$0 sm:$0xff]  ;;  %s257_s2 = smov 32   ;;  %v159_v34 = vld [vmem:[%s402_s7 + $0x8] sm:$0xff] }
   0x8   :  { %v166_v24 = vld [vmem:[%s402_s7 + $0x40] sm:$0xff]  ;;  %184 = vmatpush.msra.mxu3 %v167_v23 }
   0x9   :  { %63 = vmatpush.msra.mxu0 %v36_v9  ;;  %v162_v31 = vld [vmem:[%s402_s7 + $0x20] sm:$0xff] }
   0xa   :  { %73 = vperm.xlu0 %245, %v71_v2   ;;  %233 = vmatmul.msk.f32.vlgmr.msra.gmra.mxu0 %vm44_vm2, %v35_v10  ;;  %v158_v35 = vld [vmem:[%s402_s7] sm:$0xff] }
   0xb   :  { %185 = vmatpush.msra.mxu3 %v166_v24  ;;  %v247_v39 = vld [vmem:[%s403_s8] ss:$0 sm:$0xff] }
   0xc   :  { %v248_v42 = vld [vmem:[%s404_s9] ss:$0 sm:$0xff] }
   0xd   :  { %186 = vmatpush.msra.mxu3 %v165_v28 }
   0xf   :  { %187 = vmatpush.msra.mxu3 %v164_v29 }
  0x11   :  { %188 = vmatpush.msra.mxu3 %v163_v30 }
  0x13   :  { %189 = vmatpush.msra.mxu3 %v162_v31 }
  0x15   :  { %190 = vmatpush.msra.mxu3 %v161_v32 }
  0x17   :  { %191 = vmatpush.msra.mxu3 %v160_v33 }
  0x19   :  { %192 = vmatpush.msra.mxu3 %v159_v34 }
  0x1b   :  { %193 = vmatpush.msra.mxu3 %v158_v35 }
  0x74   :  { %v81_v13 = vpop.permute.xlu0 %80 }
  0x75   :  { %vm82_vm4 = vcmp.eq.s32.totalorder %v70_v12, %v81_v13 }
  0x76   :  { %v235_v15 = vsel %vm82_vm4, 1.0, %v256_v14 }
  0x77   :  { %239 = vmatmul.msk.f32.vlgmr.msra.gmra.mxu2 %vm116_vm3, %v235_v15 }
  0x7c   :  { %v74_v16 = vpop.permute.xlu0 %73 }
  0x7d   :  { %vm75_vm6 = vcmp.eq.s32.totalorder %v70_v12, %v74_v16 }
  0x7e   :  { %v234_v17 = vsel %vm75_vm6, 1.0, %v256_v14 }
  0x7f   :  { %237 = vmatmul.msk.f32.vlgmr.msra.gmra.mxu1 %vm87_vm5, %v234_v17 }
  0x87   :  { %v65_v19 = vpop.f32.mrf.mxu0 }
  0x88   :  { %v66_v22 = vadd.f32 %v246_v18, %v65_v19 }
  0x8a   :  { %249 = vtanh.f32 %v66_v22 }
  0x90   :  { %v250_v25 = vpop.eup %249 }
  0x91   :  { %144 = vst.msk [vmem:[#allocation2] sm:$0xff] %vm44_vm2, %v250_v25 }
  0xfa   :  { %v141_v27 = vpop.f32.mrf.mxu2 }
  0xfc   :  { %v112_v26 = vpop.f32.mrf.mxu1 }
  0xfd   :  { %146 = vrot.lane.b32.xlu1 %v112_v26, %s257_s2 }
 0x105   :  { %152 = vrot.lane.b32.xlu1 %v141_v27, %s258_s17 }
 0x16f   :  { %v147_v36 = vpop.permute.xlu1 %146 }
 0x170   :  { %150 = vst.msk [vmem:[#allocation2] sm:$0xff] %vm149_vm7, %v147_v36 }
 0x177   :  { %v153_v37 = vpop.permute.xlu1 %152 }
 0x178   :  { %156 = vst.msk [vmem:[#allocation2] sm:$0xff] %vm155_vm8, %v153_v37 }
 0x17f   :  { %v157_v38 = vld [vmem:[#allocation2] sm:$0xff] }
 0x180   :  { %240 = vmatmul.msk.f32.vlgmr.msra.gmra.mxu3 %vm174_vm9, %v157_v38 }
 0x203   :  { %v195_v40 = vpop.f32.mrf.mxu3 }
 0x204   :  { %v196_v41 = vadd.f32 %v247_v39, %v195_v40 }
 0x206   :  { %v198_v43 = vmax.f32 %v196_v41, 0.0 }
 0x208   :  { %v203_v44 = vmul.f32 %v248_v42, %v198_v43 }
 0x20a   :  { %v204_v45 = vsel %vm44_vm2, %v203_v44, 0.0 }
 0x20b   :  { %205 = vadd.xlane.f32.xlu2 %v204_v45 }
 0x27e   :  { %v206_v46 = vpop.xlane.xlu2 %205 }
 0x27f   :  { %v207_v47 = vrot.slane %v206_v46, 4 }
 0x281   :  { %v208_v48 = vmax.f32 %v206_v46, %v207_v47 }
 0x283   :  { %v209_v49 = vrot.slane %v208_v48, 2 }
 0x285   :  { %v210_v50 = vmax.f32 %v208_v48, %v209_v49 }
 0x287   :  { %v211_v51 = vrot.slane %v210_v50, 1 }
 0x289   :  { %v212_v52 = vmax.f32 %v210_v50, %v211_v51 }
 0x28b   :  { %v213_v53 = vsub.f32 %v206_v46, %v212_v52 }
 0x28d   :  { %v214_v54 = vmul.f32 1.442695, %v213_v53 }
 0x28f   :  { %251 = vpow2.f32 %v214_v54 }
 0x295   :  { %v252_v55 = vpop.eup %251 }
 0x296   :  { %v216_v56 = vrot.slane %v252_v55, 4 }
 0x298   :  { %v217_v57 = vadd.f32 %v252_v55, %v216_v56 }
 0x29a   :  { %v218_v58 = vrot.slane %v217_v57, 2 }
 0x29c   :  { %v219_v59 = vadd.f32 %v218_v58, %v217_v57 }
 0x29e   :  { %v220_v60 = vrot.slane %v219_v59, 1 }
 0x2a0   :  { %v221_v61 = vadd.f32 %v220_v60, %v219_v59 }
 0x2a2   :  { %253 = vrcp.f32 %v221_v61 }
 0x2a8   :  { %v254_v62 = vpop.eup %253 }
 0x2a9   :  { %v223_v63 = vmul.f32 %v254_v62, %v221_v61 }
 0x2ab   :  { %v224_v0 = vsub.f32 2.0, %v223_v63 }
 0x2ad   :  { %v225_v1 = vmul.f32 %v254_v62, %v224_v0 }
 0x2af   :  { %v226_v2 = vmul.f32 %v252_v55, %v225_v1 }
 0x2b1   :  { %228 = vst.msk [vmem:[%s405_s10] sm:$0xff] %vm227_vm10, %v226_v2 }

</bundles_post_ra>
